<compile_context>
chip_gen: v7x
topology: tpu7x:2x2x1
jax: 0.10.0
libtpu: 0.0.40
codegen_flags: <defaults>
</compile_context>

<pallas_src>
import math
from functools import partial

import jax
import jax.numpy as jnp
from jax import lax
from jax.experimental import pallas as pl
from jax.experimental.pallas import tpu as pltpu


# ----------------------------- Pallas kernel ------------------------------ #
def _cross_attn_kernel(q_ref, ctx_ref, wq_ref, wk_ref, wv_ref, wo_ref, bo_ref,
                       o_ref, *, num_heads, head_dim, scale):
    # q_ref  : (1, tq, Dq)   query tile
    # ctx_ref: (1, Sk, Dc)   full context for this batch element
    # wq_ref : (Dq, inner)   wk_ref/wv_ref: (Dc, inner)   wo_ref: (inner, Dq)
    # bo_ref : (1, Dq)
    q_tok = q_ref[0].astype(jnp.float32)        # (tq, Dq)
    ctx = ctx_ref[0].astype(jnp.float32)        # (Sk, Dc)
    wq = wq_ref[...].astype(jnp.float32)
    wk = wk_ref[...].astype(jnp.float32)
    wv = wv_ref[...].astype(jnp.float32)
    wo = wo_ref[...].astype(jnp.float32)

    tq = q_tok.shape[0]
    out_dim = wo.shape[1]
    acc = jnp.zeros((tq, out_dim), jnp.float32)

    # Unrolled (static) loop over heads: each head is a chain of small MXU
    # matmuls entirely in VMEM/vregs.
    for h in range(num_heads):
        lo, hi = h * head_dim, (h + 1) * head_dim
        qh = jnp.dot(q_tok, wq[:, lo:hi], preferred_element_type=jnp.float32)  # (tq, Dh)
        kh = jnp.dot(ctx,   wk[:, lo:hi], preferred_element_type=jnp.float32)  # (Sk, Dh)
        vh = jnp.dot(ctx,   wv[:, lo:hi], preferred_element_type=jnp.float32)  # (Sk, Dh)

        # scores = qh @ kh^T  (contract the head dim of both operands)
        s = lax.dot_general(qh, kh, (((1,), (1,)), ((), ())),
                            preferred_element_type=jnp.float32) * scale        # (tq, Sk)
        m = jnp.max(s, axis=-1, keepdims=True)
        e = jnp.exp(s - m)
        p = e / jnp.sum(e, axis=-1, keepdims=True)

        oh = jnp.dot(p, vh, preferred_element_type=jnp.float32)                # (tq, Dh)
        # Output projection folded per head: out += oh @ Wo[h*Dh:(h+1)*Dh, :]
        acc = acc + jnp.dot(oh, wo[lo:hi, :], preferred_element_type=jnp.float32)

    o_ref[0] = (acc + bo_ref[...].astype(jnp.float32)).astype(o_ref.dtype)


# ----------------------------- host wrapper ------------------------------- #
def _round_up(x, m):
    return (x + m - 1) // m * m


_MAX_Q_TILE = 256  # query rows per grid step (full sequence if shorter)


def cross_attention_forward(query, context, wq, wk, wv, wo, bo, *,
                            num_heads, head_dim, scale):
    B, Sq, Dq = query.shape
    Bc, Sk, Dc = context.shape
    assert B == Bc, "query/context batch mismatch"
    inner = num_heads * head_dim

    # Large q-tiles; pad the query sequence (not the tile) if it doesn't fit.
    if Sq <= _MAX_Q_TILE:
        tq, sq_pad = Sq, Sq
    else:
        tq = _MAX_Q_TILE
        sq_pad = _round_up(Sq, tq)
    if sq_pad != Sq:
        query = jnp.pad(query, ((0, 0), (0, sq_pad - Sq), (0, 0)))

    kernel = partial(_cross_attn_kernel, num_heads=num_heads,
                     head_dim=head_dim, scale=scale)

    out = pl.pallas_call(
        kernel,
        out_shape=jax.ShapeDtypeStruct((B, sq_pad, Dq), query.dtype),
        grid_spec=pltpu.PrefetchScalarGridSpec(
            num_scalar_prefetch=0,
            grid=(B, sq_pad // tq),
            in_specs=[
                pl.BlockSpec((1, tq, Dq), lambda b, i: (b, i, 0)),   # query tile
                pl.BlockSpec((1, Sk, Dc), lambda b, i: (b, 0, 0)),   # full context
                pl.BlockSpec((Dq, inner), lambda b, i: (0, 0)),      # Wq
                pl.BlockSpec((Dc, inner), lambda b, i: (0, 0)),      # Wk
                pl.BlockSpec((Dc, inner), lambda b, i: (0, 0)),      # Wv
                pl.BlockSpec((inner, Dq), lambda b, i: (0, 0)),      # Wo
                pl.BlockSpec((1, Dq), lambda b, i: (0, 0)),          # bias
            ],
            out_specs=pl.BlockSpec((1, tq, Dq), lambda b, i: (b, i, 0)),
        ),
        compiler_params=pltpu.CompilerParams(
            dimension_semantics=("parallel", "parallel")),
    )(query, context, wq, wk, wv, wo, bo)

    if sq_pad != Sq:
        out = out[:, :Sq, :]
    return out


# ------------------------------- module ----------------------------------- #
class CrossAttentionLayer:
    """JAX/Pallas port of the PyTorch CrossAttentionLayer (inference)."""

    def __init__(self, query_dim, context_dim, num_heads=8, head_dim=None,
                 dropout=0.0, key=None):
        if head_dim is None:
            if query_dim % num_heads != 0:
                raise ValueError(
                    f"query_dim ({query_dim}) must be divisible by num_heads "
                    f"({num_heads}) if head_dim is not specified.")
            head_dim = query_dim // num_heads
        self.inner_dim = head_dim * num_heads
        self.num_heads = num_heads
        self.head_dim = head_dim
        self.scale = head_dim ** (-0.5)
        self.query_dim = query_dim
        self.context_dim = context_dim
        self.dropout = dropout  # nn.Dropout is identity at inference time.

        if key is None:
            key = jax.random.PRNGKey(0)
        kq, kk, kv, ko, kb = jax.random.split(key, 5)

        def _linear_w(k, fan_in, fan_out):
            # nn.Linear-style init; stored transposed as (in, out) so the
            # kernel consumes it directly with x @ W (no transpose pass).
            bound = 1.0 / math.sqrt(fan_in)
            return jax.random.uniform(k, (fan_in, fan_out), jnp.float32,
                                      -bound, bound)

        self.wq = _linear_w(kq, query_dim, self.inner_dim)
        self.wk = _linear_w(kk, context_dim, self.inner_dim)
        self.wv = _linear_w(kv, context_dim, self.inner_dim)
        self.wo = _linear_w(ko, self.inner_dim, query_dim)
        bound = 1.0 / math.sqrt(self.inner_dim)
        self.bo = jax.random.uniform(kb, (1, query_dim), jnp.float32,
                                     -bound, bound)

    def __call__(self, query, context=None, context_mask=None):
        if context is None:
            context = query
        if context_mask is not None:
            # TODO(synk): add an additive -inf mask to the score tiles inside the kernel.
            raise NotImplementedError("context_mask is not supported yet")
        return cross_attention_forward(
            query, context, self.wq, self.wk, self.wv, self.wo, self.bo,
            num_heads=self.num_heads, head_dim=self.head_dim, scale=self.scale)


# ----------------------------- reference check ---------------------------- #
def _reference_forward(mod, query, context):
    q = query @ mod.wq
    k = context @ mod.wk
    v = context @ mod.wv
    B, Sq, _ = q.shape
    Sk = k.shape[1]
    H, Dh = mod.num_heads, mod.head_dim
    q = q.reshape(B, Sq, H, Dh).transpose(0, 2, 1, 3)
    k = k.reshape(B, Sk, H, Dh).transpose(0, 2, 1, 3)
    v = v.reshape(B, Sk, H, Dh).transpose(0, 2, 1, 3)
    s = jnp.einsum("bhqd,bhkd->bhqk", q, k) * mod.scale
    p = jax.nn.softmax(s, axis=-1)
    o = jnp.einsum("bhqk,bhkd->bhqd", p, v)
    o = o.transpose(0, 2, 1, 3).reshape(B, Sq, H * Dh)
    return o @ mod.wo + mod.bo


# --------------------------------- main ------------------------------------ #
if __name__ == "__main__":
    key = jax.random.PRNGKey(0)
    kq, kc, kp = jax.random.split(key, 3)

    B, Sq, Sk = 2, 8, 16
    query_dim, context_dim, num_heads = 32, 32, 4   # head_dim = 8

    query = jax.random.normal(kq, (B, Sq, query_dim), jnp.float32)
    context = jax.random.normal(kc, (B, Sk, context_dim), jnp.float32)

    mod = CrossAttentionLayer(query_dim, context_dim, num_heads=num_heads, key=kp)
    out = mod(query, context)
    out = jax.block_until_ready(out)

    ref = _reference_forward(mod, query, context)
    assert out.shape == (B, Sq, query_dim), out.shape
    max_err = jnp.max(jnp.abs(out - ref))
    assert jnp.allclose(out, ref, rtol=1e-4, atol=1e-4), \
        f"mismatch vs reference attention: max abs err {max_err}"

    print("KERNEL_OK")
</pallas_src>

<mosaic_0001>
module attributes {stable_mosaic.version = 11 : i64} {
  func.func @_cross_attn_kernel(%arg0: i32, %arg1: i32, %arg2: memref<1x8x32xf32, #tpu.memory_space<vmem>>, %arg3: memref<1x16x32xf32, #tpu.memory_space<vmem>>, %arg4: memref<32x32xf32, #tpu.memory_space<vmem>>, %arg5: memref<32x32xf32, #tpu.memory_space<vmem>>, %arg6: memref<32x32xf32, #tpu.memory_space<vmem>>, %arg7: memref<32x32xf32, #tpu.memory_space<vmem>>, %arg8: memref<1x32xf32, #tpu.memory_space<vmem>>, %arg9: memref<1x8x32xf32, #tpu.memory_space<vmem>>) attributes {dimension_semantics = [#tpu.dimension_semantics<parallel>, #tpu.dimension_semantics<parallel>], iteration_bounds = array<i64: 2, 1>, scalar_prefetch = 0 : i64, scratch_operands = 0 : i64, tpu.core_type = #tpu.core_type<tc>, window_params = [{transform_indices = @transform_0, window_bounds = array<i64: 1, 8, 32>}, {transform_indices = @transform_1, window_bounds = array<i64: 1, 16, 32>}, {pipeline_mode = #tpu.pipeline_mode<synchronous>, transform_indices = @transform_2, window_bounds = array<i64: 32, 32>}, {pipeline_mode = #tpu.pipeline_mode<synchronous>, transform_indices = @transform_3, window_bounds = array<i64: 32, 32>}, {pipeline_mode = #tpu.pipeline_mode<synchronous>, transform_indices = @transform_4, window_bounds = array<i64: 32, 32>}, {pipeline_mode = #tpu.pipeline_mode<synchronous>, transform_indices = @transform_5, window_bounds = array<i64: 32, 32>}, {pipeline_mode = #tpu.pipeline_mode<synchronous>, transform_indices = @transform_6, window_bounds = array<i64: 1, 32>}, {transform_indices = @transform_7, window_bounds = array<i64: 1, 8, 32>}]} {
    %c0 = arith.constant 0 : index
    %c0_0 = arith.constant 0 : index
    %c0_1 = arith.constant 0 : index
    %0 = vector.load %arg2[%c0, %c0_0, %c0_1] : memref<1x8x32xf32, #tpu.memory_space<vmem>>, vector<1x8x32xf32>
    %1 = vector.shape_cast %0 : vector<1x8x32xf32> to vector<8x32xf32>
    %c0_2 = arith.constant 0 : index
    %c0_3 = arith.constant 0 : index
    %c0_4 = arith.constant 0 : index
    %2 = vector.load %arg3[%c0_2, %c0_3, %c0_4] : memref<1x16x32xf32, #tpu.memory_space<vmem>>, vector<1x16x32xf32>
    %3 = vector.shape_cast %2 : vector<1x16x32xf32> to vector<16x32xf32>
    %c0_5 = arith.constant 0 : index
    %c0_6 = arith.constant 0 : index
    %4 = vector.load %arg4[%c0_5, %c0_6] : memref<32x32xf32, #tpu.memory_space<vmem>>, vector<32x32xf32>
    %c0_7 = arith.constant 0 : index
    %c0_8 = arith.constant 0 : index
    %5 = vector.load %arg5[%c0_7, %c0_8] : memref<32x32xf32, #tpu.memory_space<vmem>>, vector<32x32xf32>
    %c0_9 = arith.constant 0 : index
    %c0_10 = arith.constant 0 : index
    %6 = vector.load %arg6[%c0_9, %c0_10] : memref<32x32xf32, #tpu.memory_space<vmem>>, vector<32x32xf32>
    %c0_11 = arith.constant 0 : index
    %c0_12 = arith.constant 0 : index
    %7 = vector.load %arg7[%c0_11, %c0_12] : memref<32x32xf32, #tpu.memory_space<vmem>>, vector<32x32xf32>
    %cst = arith.constant 0.000000e+00 : f32
    %8 = vector.broadcast %cst : f32 to vector<8x32xf32>
    %9 = vector.extract_strided_slice %4 {offsets = [0, 0], sizes = [32, 8], strides = [1, 1]} : vector<32x32xf32> to vector<32x8xf32>
    %cst_13 = arith.constant dense<0.000000e+00> : vector<8x8xf32>
    %10 = tpu.matmul %1, %9, %cst_13 {dimension_numbers = #tpu.dot_dimension_numbers<[1], [0], [0], [1], [0, 0, 1, 1], [], []>} : vector<8x32xf32>, vector<32x8xf32>, vector<8x8xf32> -> vector<8x8xf32>
    %11 = vector.extract_strided_slice %5 {offsets = [0, 0], sizes = [32, 8], strides = [1, 1]} : vector<32x32xf32> to vector<32x8xf32>
    %cst_14 = arith.constant dense<0.000000e+00> : vector<16x8xf32>
    %12 = tpu.matmul %3, %11, %cst_14 {dimension_numbers = #tpu.dot_dimension_numbers<[1], [0], [0], [1], [0, 0, 1, 1], [], []>} : vector<16x32xf32>, vector<32x8xf32>, vector<16x8xf32> -> vector<16x8xf32>
    %13 = vector.extract_strided_slice %6 {offsets = [0, 0], sizes = [32, 8], strides = [1, 1]} : vector<32x32xf32> to vector<32x8xf32>
    %cst_15 = arith.constant dense<0.000000e+00> : vector<16x8xf32>
    %14 = tpu.matmul %3, %13, %cst_15 {dimension_numbers = #tpu.dot_dimension_numbers<[1], [0], [0], [1], [0, 0, 1, 1], [], []>} : vector<16x32xf32>, vector<32x8xf32>, vector<16x8xf32> -> vector<16x8xf32>
    %cst_16 = arith.constant dense<0.000000e+00> : vector<8x16xf32>
    %15 = tpu.matmul %10, %12, %cst_16 {dimension_numbers = #tpu.dot_dimension_numbers<[1], [1], [0], [0], [0, 0, 1, 0], [], []>} : vector<8x8xf32>, vector<16x8xf32>, vector<8x16xf32> -> vector<8x16xf32>
    %cst_17 = arith.constant 0.353553385 : f32
    %16 = vector.broadcast %cst_17 : f32 to vector<8x16xf32>
    %17 = arith.mulf %15, %16 : vector<8x16xf32>
    %cst_18 = arith.constant dense<0xFF800000> : vector<8xf32>
    %18 = vector.multi_reduction <maximumf>, %17, %cst_18 [1] : vector<8x16xf32> to vector<8xf32>
    %19 = vector.shape_cast %18 : vector<8xf32> to vector<8x1xf32>
    %20 = vector.broadcast %19 : vector<8x1xf32> to vector<8x16xf32>
    %21 = arith.subf %17, %20 : vector<8x16xf32>
    %22 = math.exp %21 : vector<8x16xf32>
    %cst_19 = arith.constant dense<0.000000e+00> : vector<8xf32>
    %23 = vector.multi_reduction <add>, %22, %cst_19 [1] : vector<8x16xf32> to vector<8xf32>
    %24 = vector.shape_cast %23 : vector<8xf32> to vector<8x1xf32>
    %25 = vector.broadcast %24 : vector<8x1xf32> to vector<8x16xf32>
    %26 = arith.divf %22, %25 : vector<8x16xf32>
    %cst_20 = arith.constant dense<0.000000e+00> : vector<8x8xf32>
    %27 = tpu.matmul %26, %14, %cst_20 {dimension_numbers = #tpu.dot_dimension_numbers<[1], [0], [0], [1], [0, 0, 1, 1], [], []>} : vector<8x16xf32>, vector<16x8xf32>, vector<8x8xf32> -> vector<8x8xf32>
    %28 = vector.extract_strided_slice %7 {offsets = [0, 0], sizes = [8, 32], strides = [1, 1]} : vector<32x32xf32> to vector<8x32xf32>
    %cst_21 = arith.constant dense<0.000000e+00> : vector<8x32xf32>
    %29 = tpu.matmul %27, %28, %cst_21 {dimension_numbers = #tpu.dot_dimension_numbers<[1], [0], [0], [1], [0, 0, 1, 1], [], []>} : vector<8x8xf32>, vector<8x32xf32>, vector<8x32xf32> -> vector<8x32xf32>
    %30 = arith.addf %8, %29 : vector<8x32xf32>
    %31 = vector.extract_strided_slice %4 {offsets = [0, 8], sizes = [32, 8], strides = [1, 1]} : vector<32x32xf32> to vector<32x8xf32>
    %cst_22 = arith.constant dense<0.000000e+00> : vector<8x8xf32>
    %32 = tpu.matmul %1, %31, %cst_22 {dimension_numbers = #tpu.dot_dimension_numbers<[1], [0], [0], [1], [0, 0, 1, 1], [], []>} : vector<8x32xf32>, vector<32x8xf32>, vector<8x8xf32> -> vector<8x8xf32>
    %33 = vector.extract_strided_slice %5 {offsets = [0, 8], sizes = [32, 8], strides = [1, 1]} : vector<32x32xf32> to vector<32x8xf32>
    %cst_23 = arith.constant dense<0.000000e+00> : vector<16x8xf32>
    %34 = tpu.matmul %3, %33, %cst_23 {dimension_numbers = #tpu.dot_dimension_numbers<[1], [0], [0], [1], [0, 0, 1, 1], [], []>} : vector<16x32xf32>, vector<32x8xf32>, vector<16x8xf32> -> vector<16x8xf32>
    %35 = vector.extract_strided_slice %6 {offsets = [0, 8], sizes = [32, 8], strides = [1, 1]} : vector<32x32xf32> to vector<32x8xf32>
    %cst_24 = arith.constant dense<0.000000e+00> : vector<16x8xf32>
    %36 = tpu.matmul %3, %35, %cst_24 {dimension_numbers = #tpu.dot_dimension_numbers<[1], [0], [0], [1], [0, 0, 1, 1], [], []>} : vector<16x32xf32>, vector<32x8xf32>, vector<16x8xf32> -> vector<16x8xf32>
    %cst_25 = arith.constant dense<0.000000e+00> : vector<8x16xf32>
    %37 = tpu.matmul %32, %34, %cst_25 {dimension_numbers = #tpu.dot_dimension_numbers<[1], [1], [0], [0], [0, 0, 1, 0], [], []>} : vector<8x8xf32>, vector<16x8xf32>, vector<8x16xf32> -> vector<8x16xf32>
    %cst_26 = arith.constant 0.353553385 : f32
    %38 = vector.broadcast %cst_26 : f32 to vector<8x16xf32>
    %39 = arith.mulf %37, %38 : vector<8x16xf32>
    %cst_27 = arith.constant dense<0xFF800000> : vector<8xf32>
    %40 = vector.multi_reduction <maximumf>, %39, %cst_27 [1] : vector<8x16xf32> to vector<8xf32>
    %41 = vector.shape_cast %40 : vector<8xf32> to vector<8x1xf32>
    %42 = vector.broadcast %41 : vector<8x1xf32> to vector<8x16xf32>
    %43 = arith.subf %39, %42 : vector<8x16xf32>
    %44 = math.exp %43 : vector<8x16xf32>
    %cst_28 = arith.constant dense<0.000000e+00> : vector<8xf32>
    %45 = vector.multi_reduction <add>, %44, %cst_28 [1] : vector<8x16xf32> to vector<8xf32>
    %46 = vector.shape_cast %45 : vector<8xf32> to vector<8x1xf32>
    %47 = vector.broadcast %46 : vector<8x1xf32> to vector<8x16xf32>
    %48 = arith.divf %44, %47 : vector<8x16xf32>
    %cst_29 = arith.constant dense<0.000000e+00> : vector<8x8xf32>
    %49 = tpu.matmul %48, %36, %cst_29 {dimension_numbers = #tpu.dot_dimension_numbers<[1], [0], [0], [1], [0, 0, 1, 1], [], []>} : vector<8x16xf32>, vector<16x8xf32>, vector<8x8xf32> -> vector<8x8xf32>
    %50 = vector.extract_strided_slice %7 {offsets = [8, 0], sizes = [8, 32], strides = [1, 1]} : vector<32x32xf32> to vector<8x32xf32>
    %cst_30 = arith.constant dense<0.000000e+00> : vector<8x32xf32>
    %51 = tpu.matmul %49, %50, %cst_30 {dimension_numbers = #tpu.dot_dimension_numbers<[1], [0], [0], [1], [0, 0, 1, 1], [], []>} : vector<8x8xf32>, vector<8x32xf32>, vector<8x32xf32> -> vector<8x32xf32>
    %52 = arith.addf %30, %51 : vector<8x32xf32>
    %53 = vector.extract_strided_slice %4 {offsets = [0, 16], sizes = [32, 8], strides = [1, 1]} : vector<32x32xf32> to vector<32x8xf32>
    %cst_31 = arith.constant dense<0.000000e+00> : vector<8x8xf32>
    %54 = tpu.matmul %1, %53, %cst_31 {dimension_numbers = #tpu.dot_dimension_numbers<[1], [0], [0], [1], [0, 0, 1, 1], [], []>} : vector<8x32xf32>, vector<32x8xf32>, vector<8x8xf32> -> vector<8x8xf32>
    %55 = vector.extract_strided_slice %5 {offsets = [0, 16], sizes = [32, 8], strides = [1, 1]} : vector<32x32xf32> to vector<32x8xf32>
    %cst_32 = arith.constant dense<0.000000e+00> : vector<16x8xf32>
    %56 = tpu.matmul %3, %55, %cst_32 {dimension_numbers = #tpu.dot_dimension_numbers<[1], [0], [0], [1], [0, 0, 1, 1], [], []>} : vector<16x32xf32>, vector<32x8xf32>, vector<16x8xf32> -> vector<16x8xf32>
    %57 = vector.extract_strided_slice %6 {offsets = [0, 16], sizes = [32, 8], strides = [1, 1]} : vector<32x32xf32> to vector<32x8xf32>
    %cst_33 = arith.constant dense<0.000000e+00> : vector<16x8xf32>
    %58 = tpu.matmul %3, %57, %cst_33 {dimension_numbers = #tpu.dot_dimension_numbers<[1], [0], [0], [1], [0, 0, 1, 1], [], []>} : vector<16x32xf32>, vector<32x8xf32>, vector<16x8xf32> -> vector<16x8xf32>
    %cst_34 = arith.constant dense<0.000000e+00> : vector<8x16xf32>
    %59 = tpu.matmul %54, %56, %cst_34 {dimension_numbers = #tpu.dot_dimension_numbers<[1], [1], [0], [0], [0, 0, 1, 0], [], []>} : vector<8x8xf32>, vector<16x8xf32>, vector<8x16xf32> -> vector<8x16xf32>
    %cst_35 = arith.constant 0.353553385 : f32
    %60 = vector.broadcast %cst_35 : f32 to vector<8x16xf32>
    %61 = arith.mulf %59, %60 : vector<8x16xf32>
    %cst_36 = arith.constant dense<0xFF800000> : vector<8xf32>
    %62 = vector.multi_reduction <maximumf>, %61, %cst_36 [1] : vector<8x16xf32> to vector<8xf32>
    %63 = vector.shape_cast %62 : vector<8xf32> to vector<8x1xf32>
    %64 = vector.broadcast %63 : vector<8x1xf32> to vector<8x16xf32>
    %65 = arith.subf %61, %64 : vector<8x16xf32>
    %66 = math.exp %65 : vector<8x16xf32>
    %cst_37 = arith.constant dense<0.000000e+00> : vector<8xf32>
    %67 = vector.multi_reduction <add>, %66, %cst_37 [1] : vector<8x16xf32> to vector<8xf32>
    %68 = vector.shape_cast %67 : vector<8xf32> to vector<8x1xf32>
    %69 = vector.broadcast %68 : vector<8x1xf32> to vector<8x16xf32>
    %70 = arith.divf %66, %69 : vector<8x16xf32>
    %cst_38 = arith.constant dense<0.000000e+00> : vector<8x8xf32>
    %71 = tpu.matmul %70, %58, %cst_38 {dimension_numbers = #tpu.dot_dimension_numbers<[1], [0], [0], [1], [0, 0, 1, 1], [], []>} : vector<8x16xf32>, vector<16x8xf32>, vector<8x8xf32> -> vector<8x8xf32>
    %72 = vector.extract_strided_slice %7 {offsets = [16, 0], sizes = [8, 32], strides = [1, 1]} : vector<32x32xf32> to vector<8x32xf32>
    %cst_39 = arith.constant dense<0.000000e+00> : vector<8x32xf32>
    %73 = tpu.matmul %71, %72, %cst_39 {dimension_numbers = #tpu.dot_dimension_numbers<[1], [0], [0], [1], [0, 0, 1, 1], [], []>} : vector<8x8xf32>, vector<8x32xf32>, vector<8x32xf32> -> vector<8x32xf32>
    %74 = arith.addf %52, %73 : vector<8x32xf32>
    %75 = vector.extract_strided_slice %4 {offsets = [0, 24], sizes = [32, 8], strides = [1, 1]} : vector<32x32xf32> to vector<32x8xf32>
    %cst_40 = arith.constant dense<0.000000e+00> : vector<8x8xf32>
    %76 = tpu.matmul %1, %75, %cst_40 {dimension_numbers = #tpu.dot_dimension_numbers<[1], [0], [0], [1], [0, 0, 1, 1], [], []>} : vector<8x32xf32>, vector<32x8xf32>, vector<8x8xf32> -> vector<8x8xf32>
    %77 = vector.extract_strided_slice %5 {offsets = [0, 24], sizes = [32, 8], strides = [1, 1]} : vector<32x32xf32> to vector<32x8xf32>
    %cst_41 = arith.constant dense<0.000000e+00> : vector<16x8xf32>
    %78 = tpu.matmul %3, %77, %cst_41 {dimension_numbers = #tpu.dot_dimension_numbers<[1], [0], [0], [1], [0, 0, 1, 1], [], []>} : vector<16x32xf32>, vector<32x8xf32>, vector<16x8xf32> -> vector<16x8xf32>
    %79 = vector.extract_strided_slice %6 {offsets = [0, 24], sizes = [32, 8], strides = [1, 1]} : vector<32x32xf32> to vector<32x8xf32>
    %cst_42 = arith.constant dense<0.000000e+00> : vector<16x8xf32>
    %80 = tpu.matmul %3, %79, %cst_42 {dimension_numbers = #tpu.dot_dimension_numbers<[1], [0], [0], [1], [0, 0, 1, 1], [], []>} : vector<16x32xf32>, vector<32x8xf32>, vector<16x8xf32> -> vector<16x8xf32>
    %cst_43 = arith.constant dense<0.000000e+00> : vector<8x16xf32>
    %81 = tpu.matmul %76, %78, %cst_43 {dimension_numbers = #tpu.dot_dimension_numbers<[1], [1], [0], [0], [0, 0, 1, 0], [], []>} : vector<8x8xf32>, vector<16x8xf32>, vector<8x16xf32> -> vector<8x16xf32>
    %cst_44 = arith.constant 0.353553385 : f32
    %82 = vector.broadcast %cst_44 : f32 to vector<8x16xf32>
    %83 = arith.mulf %81, %82 : vector<8x16xf32>
    %cst_45 = arith.constant dense<0xFF800000> : vector<8xf32>
    %84 = vector.multi_reduction <maximumf>, %83, %cst_45 [1] : vector<8x16xf32> to vector<8xf32>
    %85 = vector.shape_cast %84 : vector<8xf32> to vector<8x1xf32>
    %86 = vector.broadcast %85 : vector<8x1xf32> to vector<8x16xf32>
    %87 = arith.subf %83, %86 : vector<8x16xf32>
    %88 = math.exp %87 : vector<8x16xf32>
    %cst_46 = arith.constant dense<0.000000e+00> : vector<8xf32>
    %89 = vector.multi_reduction <add>, %88, %cst_46 [1] : vector<8x16xf32> to vector<8xf32>
    %90 = vector.shape_cast %89 : vector<8xf32> to vector<8x1xf32>
    %91 = vector.broadcast %90 : vector<8x1xf32> to vector<8x16xf32>
    %92 = arith.divf %88, %91 : vector<8x16xf32>
    %cst_47 = arith.constant dense<0.000000e+00> : vector<8x8xf32>
    %93 = tpu.matmul %92, %80, %cst_47 {dimension_numbers = #tpu.dot_dimension_numbers<[1], [0], [0], [1], [0, 0, 1, 1], [], []>} : vector<8x16xf32>, vector<16x8xf32>, vector<8x8xf32> -> vector<8x8xf32>
    %94 = vector.extract_strided_slice %7 {offsets = [24, 0], sizes = [8, 32], strides = [1, 1]} : vector<32x32xf32> to vector<8x32xf32>
    %cst_48 = arith.constant dense<0.000000e+00> : vector<8x32xf32>
    %95 = tpu.matmul %93, %94, %cst_48 {dimension_numbers = #tpu.dot_dimension_numbers<[1], [0], [0], [1], [0, 0, 1, 1], [], []>} : vector<8x8xf32>, vector<8x32xf32>, vector<8x32xf32> -> vector<8x32xf32>
    %96 = arith.addf %74, %95 : vector<8x32xf32>
    %c0_49 = arith.constant 0 : index
    %c0_50 = arith.constant 0 : index
    %97 = vector.load %arg8[%c0_49, %c0_50] : memref<1x32xf32, #tpu.memory_space<vmem>>, vector<1x32xf32>
    %98 = vector.broadcast %97 : vector<1x32xf32> to vector<8x32xf32>
    %99 = arith.addf %96, %98 : vector<8x32xf32>
    %c0_51 = arith.constant 0 : index
    %c0_52 = arith.constant 0 : index
    %c0_53 = arith.constant 0 : index
    %100 = vector.load %arg9[%c0_51, %c0_52, %c0_53] : memref<1x8x32xf32, #tpu.memory_space<vmem>>, vector<1x8x32xf32>
    %101 = vector.shape_cast %100 : vector<1x8x32xf32> to vector<8x32xf32>
    %102 = vector.shape_cast %99 : vector<8x32xf32> to vector<1x8x32xf32>
    tpu.vector_store %arg9[%c0_51, %c0_52, %c0_53], %102 {strides = array<i32>} : memref<1x8x32xf32, #tpu.memory_space<vmem>>, vector<1x8x32xf32>,
    return
  }
  func.func @transform_0(%arg0: i32, %arg1: i32) -> (i32, i32, i32) {
    %c0_i32 = arith.constant 0 : i32
    %c0_i32_0 = arith.constant 0 : i32
    return %arg0, %arg1, %c0_i32 : i32, i32, i32
  }
  func.func @transform_1(%arg0: i32, %arg1: i32) -> (i32, i32, i32) {
    %c0_i32 = arith.constant 0 : i32
    %c0_i32_0 = arith.constant 0 : i32
    %c0_i32_1 = arith.constant 0 : i32
    return %arg0, %c0_i32, %c0_i32_0 : i32, i32, i32
  }
  func.func @transform_2(%arg0: i32, %arg1: i32) -> (i32, i32) {
    %c0_i32 = arith.constant 0 : i32
    %c0_i32_0 = arith.constant 0 : i32
    %c0_i32_1 = arith.constant 0 : i32
    return %c0_i32, %c0_i32_0 : i32, i32
  }
  func.func @transform_3(%arg0: i32, %arg1: i32) -> (i32, i32) {
    %c0_i32 = arith.constant 0 : i32
    %c0_i32_0 = arith.constant 0 : i32
    %c0_i32_1 = arith.constant 0 : i32
    return %c0_i32, %c0_i32_0 : i32, i32
  }
  func.func @transform_4(%arg0: i32, %arg1: i32) -> (i32, i32) {
    %c0_i32 = arith.constant 0 : i32
    %c0_i32_0 = arith.constant 0 : i32
    %c0_i32_1 = arith.constant 0 : i32
    return %c0_i32, %c0_i32_0 : i32, i32
  }
  func.func @transform_5(%arg0: i32, %arg1: i32) -> (i32, i32) {
    %c0_i32 = arith.constant 0 : i32
    %c0_i32_0 = arith.constant 0 : i32
    %c0_i32_1 = arith.constant 0 : i32
    return %c0_i32, %c0_i32_0 : i32, i32
  }
  func.func @transform_6(%arg0: i32, %arg1: i32) -> (i32, i32) {
    %c0_i32 = arith.constant 0 : i32
    %c0_i32_0 = arith.constant 0 : i32
    %c0_i32_1 = arith.constant 0 : i32
    return %c0_i32, %c0_i32_0 : i32, i32
  }
  func.func @transform_7(%arg0: i32, %arg1: i32) -> (i32, i32, i32) {
    %c0_i32 = arith.constant 0 : i32
    %c0_i32_0 = arith.constant 0 : i32
    return %arg0, %arg1, %c0_i32 : i32, i32, i32
  }
}

</mosaic_0001>

<bundles_post_ra>
// kernel: tpu_custom_call.1
= control target key start
LH: loop header
LB: loop body
LE: loop exit
PB: predicated region body
PF: predicated region fallthrough
CT: control target
= control target key end

     0   :  { %s4178_s0 = inlined_call_operand.hbm [shape: f32[2,8,32], index: 0, kind: input, shape index: {}]   ;;  %s4179_s1 = inlined_call_operand.hbm [shape: f32[2,16,32], index: 1, kind: input, shape index: {}]   ;;  %s4180_s2 = inlined_call_operand.hbm [shape: f32[32,32], index: 2, kind: input, shape index: {}]   ;;  %s4181_s3 = inlined_call_operand.hbm [shape: f32[32,32], index: 3, kind: input, shape index: {}]   ;;  %s4182_s4 = inlined_call_operand.hbm [shape: f32[32,32], index: 4, kind: input, shape index: {}]   ;;  %s4183_s5 = inlined_call_operand.hbm [shape: f32[32,32], index: 5, kind: input, shape index: {}]   ;;  %s4184_s6 = inlined_call_operand.vmem [shape: f32[1,32], index: 6, kind: input, shape index: {}]   ;;  %s4185_s7 = inlined_call_operand.hbm [shape: f32[2,8,32], index: 7, kind: output, shape index: {}]  }
   0x1   :  { %4192 = sst [smem:[#allocation20_spill]] %s4178_s0 }
   0x2   :  { %4193 = sst [smem:[#allocation21_spill]] %s4180_s2 }
   0x3   :  { %4194 = sst [smem:[#allocation22_spill]] %s4181_s3 }
   0x4   :  { %4195 = sst [smem:[#allocation23_spill]] %s4182_s4 }
   0x5   :  { %4196 = sst [smem:[#allocation24_spill]] %s4185_s7 }
   0x6   :  { %12 = vsyncpa [#allocation3], 0 }
   0x7   :  { %14 = vsyncpa [#allocation3 + $0x1], 0 }
   0x8   :  { %15 = vsyncpa [#allocation6], 0 }
   0x9   :  { %17 = vsyncpa [#allocation6 + $0x1], 0 }
   0xa   :  { %18 = vsyncpa [#allocation9], 0 }
   0xb   :  { %19 = vsyncpa [#allocation12], 0 }
   0xc   :  { %20 = vsyncpa [#allocation4], 0 }
   0xd   :  { %22 = vsyncpa [#allocation4 + $0x1], 0  ;;  %s3595_s24 = smov 0   ;;  %s3597_s25 = smov 0  }
   0xe   :  { %s3599_s26 = smov 0   ;;  %s3601_s27 = smov 0  }
   0xf   :  { %s3603_s28 = smov 0   ;;  %s3605_s29 = smov 0  }
  0x10 LB: > { %s3626_s30 = sadd.s32 4294967295, %s3538_s29   ;;  %p2557_p0 = scmp.ge.s32.totalorder %s3538_s29, 1  ;;  %s3538_s29 = sphi %s3605_s29, %s28_s29   ;;  %s3534_s28 = sphi %s3603_s28, %s4230_s28   ;;  %s3530_s27 = sphi %s3601_s27, %s4229_s27   ;;  %s3526_s26 = sphi %s3599_s26, %s4228_s26   ;;  %s3522_s25 = sphi %s3597_s25, %s4227_s25   ;;  %s3518_s24 = sphi %s3595_s24, %s4226_s24  }
  0x11   : > { %p4187_p1 = scmp.eq.s32.totalorder %s3626_s30, 0  ;;  %p232_p2 = scmp.lt.s32.totalorder %s3538_s29, 3 }
  0x12   : > { %s3540_s9 = smov [#allocation7]   ;;  %s3541_s12 = smov [#allocation8]  }
  0x13   : > { %p3631_p3 = pnand %p2557_p0, %p232_p2  ;;  %s244_s10 = sshll.u32 %s3540_s9, 4  ;;  %s3635_s10 = int_to_ptr.vmem [resolvable:$true] %s244_s10 }
  0x14   : > { %s257_s13 = sshll.u32 %s3541_s12, 4  ;;  %s3542_s14 = smov [#allocation10]   ;;  %s3646_s13 = int_to_ptr.vmem [resolvable:$true] %s257_s13 }
  0x15   : > { %s4197_s8 = scalar_select %p3631_p3, 1, 0 }
  0x16   : > { %p3068_p4 = pneg %p3631_p3  ;;  %s3648_s15 = sshll.u32 %s3542_s14, 4  ;;  %s271_s15 = int_to_ptr.vmem [resolvable:$true] %s3648_s15 }
  0x17   : > { %s4199_s2 = sld [smem:[#allocation21_spill]] }
  0x18   : > { %p3642_p6 = pnand %p3068_p4, %p4187_p1 }
  0x1a   : > { %p3658_p8 = pneg %p3642_p6 }
  0x1d   : > { %s3268_s18 = scalar_lea.hbm %s4199_s2, 512 }
  0x1e   : > { %p3269_p7 = scmp.ne.s32.totalorder %s4199_s2, %s3268_s18  ;;  %p3275_p11 = scmp.lt.u32.totalorder %s3268_s18, %s4199_s2 }
  0x20   : > { %p3271_p9 = pnand %p3658_p8, %p3269_p7 }
  0x22   : > { %p3272_p10 = pneg %p3271_p9 }
  0x24   : > { %p3277_p12 = pnand %p3275_p11, %p3272_p10 }
  0x26   : > { %3280 = shalt.err (!%p3277_p12)
}
  0x27   : > { %s3281_s9 = scalar_lea.vmem %s3635_s10, 512  ;;  %p3289_p4 = scmp.lt.s32.totalorder %s3635_s10, %s3635_s10 }
  0x28   : > { %p3282_p13 = scmp.ne.s32.totalorder %s3635_s10, %s3281_s9  ;;  %p3290_p5 = scmp.lt.s32.totalorder %s3281_s9, %s3281_s9 }
  0x2a   : > { %p3284_p0 = pnand %p3282_p13, %p3658_p8  ;;  %p3291_p7 = por %p3290_p5, %p3289_p4 }
  0x2c   : > { %p3285_p2 = pneg %p3284_p0 }
  0x2e   : > { %p3292_p9 = pnand %p3291_p7, %p3285_p2 }
  0x30   : > { %3295 = shalt.err (!%p3292_p9)
}
  0x31   : > { %s4189_s12 = smov 128   ;;  %s4190_s14 = smov 8  }
  0x32   : > { %3071 = dma.hbm_to_vmem [thread:$0]  (!%p3642_p6), %s4199_s2, 512, %s3635_s10, [#allocation6], %s4189_s12, %s4189_s12, %s4190_s14  }
  0x33   : > { %s4201_s3 = sld [smem:[#allocation22_spill]] }
  0x39   : > { %s3296_s20 = scalar_lea.hbm %s4201_s3, 512 }
  0x3a   : > { %p3297_p5 = scmp.ne.s32.totalorder %s4201_s3, %s3296_s20  ;;  %p3303_p12 = scmp.lt.u32.totalorder %s3296_s20, %s4201_s3 }
  0x3c   : > { %p3299_p10 = pnand %p3297_p5, %p3658_p8 }
  0x3e   : > { %p3300_p11 = pneg %p3299_p10 }
  0x40   : > { %p3305_p13 = pnand %p3303_p12, %p3300_p11 }
  0x42   : > { %3308 = shalt.err (!%p3305_p13)
}
  0x43   : > { %s3309_s10 = scalar_lea.vmem %s3646_s13, 512  ;;  %p3317_p7 = scmp.lt.s32.totalorder %s3646_s13, %s3646_s13 }
  0x44   : > { %p3310_p0 = scmp.ne.s32.totalorder %s3646_s13, %s3309_s10  ;;  %p3318_p9 = scmp.lt.s32.totalorder %s3309_s10, %s3309_s10 }
  0x46   : > { %p3312_p2 = pnand %p3310_p0, %p3658_p8  ;;  %p3319_p5 = por %p3318_p9, %p3317_p7 }
  0x48   : > { %p3313_p4 = pneg %p3312_p2 }
  0x4a   : > { %p3320_p10 = pnand %p3319_p5, %p3313_p4 }
  0x4c   : > { %3323 = shalt.err (!%p3320_p10)
}
  0x4d   : > { %3074 = dma.hbm_to_vmem [thread:$0]  (!%p3642_p6), %s4201_s3, 512, %s3646_s13, [#allocation9], %s4189_s12, %s4189_s12, %s4190_s14  }
  0x4e   : > { %s4202_s4 = sld [smem:[#allocation23_spill]] }
  0x54   : > { %s3324_s19 = scalar_lea.hbm %s4202_s4, 512 }
  0x55   : > { %p3325_p11 = scmp.ne.s32.totalorder %s4202_s4, %s3324_s19  ;;  %p3331_p0 = scmp.lt.u32.totalorder %s3324_s19, %s4202_s4 }
  0x57   : > { %p3327_p12 = pnand %p3325_p11, %p3658_p8 }
  0x59   : > { %p3328_p13 = pneg %p3327_p12 }
  0x5b   : > { %p3333_p2 = pnand %p3331_p0, %p3328_p13 }
  0x5d   : > { %3336 = shalt.err (!%p3333_p2)
}
  0x5e   : > { %s3337_s10 = scalar_lea.vmem %s271_s15, 512  ;;  %p3345_p5 = scmp.lt.s32.totalorder %s271_s15, %s271_s15 }
  0x5f   : > { %p3338_p4 = scmp.ne.s32.totalorder %s271_s15, %s3337_s10  ;;  %p3346_p10 = scmp.lt.s32.totalorder %s3337_s10, %s3337_s10 }
  0x61   : > { %p3340_p7 = pnand %p3338_p4, %p3658_p8  ;;  %p3347_p1 = por %p3346_p10, %p3345_p5 }
  0x63   : > { %p3341_p9 = pneg %p3340_p7 }
  0x65   : > { %p3348_p3 = pnand %p3347_p1, %p3341_p9 }
  0x67   : > { %3351 = shalt.err (!%p3348_p3)
}
  0x68   : > { %3077 = dma.hbm_to_vmem [thread:$0]  (!%p3642_p6), %s4202_s4, 512, %s271_s15, [#allocation9], %s4189_s12, %s4189_s12, %s4190_s14  }
  0x69   : > { %s3545_s16 = smov [#allocation11]   ;;  %s3352_s20 = scalar_lea.hbm %s4183_s5, 512 }
  0x6a   : > { %s283_s17 = sshll.u32 %s3545_s16, 4  ;;  %p3353_p1 = scmp.ne.s32.totalorder %s4183_s5, %s3352_s20  ;;  %s284_s17 = int_to_ptr.vmem [resolvable:$true] %s283_s17 }
  0x6b   : > { %p3359_p12 = scmp.lt.u32.totalorder %s3352_s20, %s4183_s5 }
  0x6c   : > { %p3355_p3 = pnand %p3353_p1, %p3658_p8 }
  0x6e   : > { %p3356_p11 = pneg %p3355_p3 }
  0x70   : > { %p3361_p13 = pnand %p3359_p12, %p3356_p11 }
  0x72   : > { %3364 = shalt.err (!%p3361_p13)
}
  0x73   : > { %s3365_s15 = scalar_lea.vmem %s284_s17, 512  ;;  %p3373_p7 = scmp.lt.s32.totalorder %s284_s17, %s284_s17 }
  0x74   : > { %p3366_p0 = scmp.ne.s32.totalorder %s284_s17, %s3365_s15  ;;  %p3374_p9 = scmp.lt.s32.totalorder %s3365_s15, %s3365_s15 }
  0x76   : > { %p3368_p2 = pnand %p3366_p0, %p3658_p8  ;;  %p3375_p5 = por %p3374_p9, %p3373_p7 }
  0x78   : > { %p3369_p4 = pneg %p3368_p2 }
  0x7a   : > { %p3376_p10 = pnand %p3375_p5, %p3369_p4 }
  0x7c   : > { %3379 = shalt.err (!%p3376_p10)
}
  0x7d   : > { %3080 = dma.hbm_to_vmem [thread:$0]  (!%p3642_p6), %s4183_s5, 512, %s284_s17, [#allocation12], %s4189_s12, %s4189_s12, %s4190_s14  }
  0x7e   : > { %s2556_s11 = sadd.s32 4294967294, %s3538_s29   ;;  %s40_s21 = sadd.s32 1, %s3534_s28 }
  0x7f   : > { %p42_p8 = scmp.ge.s32.totalorder %s40_s21, 2  ;;  %s49_s16 = sadd.s32 1, %s3526_s26 }
  0x80   : > { %p56_p1 = scmp.ne.s32.totalorder %s3526_s26, %s3522_s25  ;;  %p57_p3 = scmp.eq.s32.totalorder %s3538_s29, 0 }
  0x81   : > { %s4232_s21 = smov (%p42_p8, %s40_s21), 0  ;;  %p62_p12 = scmp.ne.s32.totalorder %s3522_s25, %s3518_s24 }
  0x82   : > { %p3759_p11 = por %p57_p3, %p56_p1  ;;  %s44_s17 = ssub.s32 %s3534_s28, %s4232_s21 }
  0x83   : > { %p219_p6 = scmp.eq.s32.totalorder %s3626_s30, 1  ;;  %p47_p13 = scmp.eq.s32.totalorder %s44_s17, 0 }
  0x84   : > { %p4204_p0 = scmp.eq.s32.totalorder %s3626_s30, 0  ;;  %p225_p7 = scmp.eq.s32.totalorder %s2556_s11, 1 }
  0x85   : > { %p3774_p4 = por %p219_p6, %p56_p1  ;;  %p3096_p5 = scmp.lt.s32.totalorder %s3538_s29, 2 }
  0x86   : > { %p3770_p2 = por %p4204_p0, %p62_p12  ;;  %p3781_p9 = por %p225_p7, %p62_p12 }
  0x87   : > { %s4206_s20 = scalar_select %p3774_p4, 1, 0 }
  0x88   : > { %s3779_s22 = scalar_select %p47_p13, %s3526_s26, %s49_s16  }
  0x89   : > { %s4207_s23 = scalar_select %p3781_p9, 1, 0 }
  0x8a   : > { %s3787_s9 = sand.u32 1, %s3526_s26   ;;  %s2564_s10 = sshll.u32 %s3534_s28, 7 }
  0x8b   : > { %s2563_s15 = sshll.u32 %s3787_s9, 3  ;;  %s4208_s0 = sld [smem:[#allocation20_spill]] }
  0x8c   : > { %s304_s11 = scalar_lea.vmem [#allocation2], %s2563_s15  ;;  %p3798_p10 = pnand %p3096_p5, %p3759_p11 }
  0x8d   : > { %s312_s16 = sshll.u32 %s304_s11, 4  ;;  %s301_s2 = scalar_lea.sflag [#allocation3], %s3787_s9  ;;  %s3802_s16 = int_to_ptr.vmem [resolvable:$true] %s312_s16 }
  0x8e   : > { %p3382_p1 = pneg %p3798_p10 }
  0x91   : > { %s3794_s17 = scalar_lea.hbm %s4208_s0, %s2564_s10  ;;  %s3385_s15 = scalar_lea.hbm %s4208_s0, 256 }
  0x92   : > { %s3380_s13 = scalar_lea.hbm %s3794_s17, 128  ;;  %p3386_p11 = scmp.lt.u32.totalorder %s3794_s17, %s4208_s0 }
  0x93   : > { %p3381_p8 = scmp.ne.s32.totalorder %s3794_s17, %s3380_s13  ;;  %p3387_p6 = scmp.lt.u32.totalorder %s3385_s15, %s3380_s13 }
  0x94   : > { %p3389_p0 = scmp.lt.u32.totalorder %s3380_s13, %s3794_s17 }
  0x95   : > { %p3383_p3 = pnand %p3382_p1, %p3381_p8  ;;  %p3388_p13 = por %p3387_p6, %p3386_p11 }
  0x97   : > { %p3384_p12 = pneg %p3383_p3  ;;  %p3390_p7 = por %p3389_p0, %p3388_p13 }
  0x99   : > { %p3391_p5 = pnand %p3390_p7, %p3384_p12 }
  0x9b   : > { %3394 = shalt.err (!%p3391_p5)
}
  0x9c   : > { %s3395_s14 = scalar_lea.vmem %s3802_s16, 128  ;;  %s3546_s10 = smov [#allocation2]  }
  0x9d   : > { %p3396_p8 = scmp.ne.s32.totalorder %s3802_s16, %s3395_s14  ;;  %s3400_s18 = sshll.u32 %s3546_s10, 4  ;;  %s3401_s18 = int_to_ptr.vmem [resolvable:$false] %s3400_s18 }
  0x9e   : > { %s3402_s7 = scalar_lea.vmem %s3401_s18, 256  ;;  %p3403_p4 = scmp.lt.s32.totalorder %s3802_s16, %s3401_s18 }
  0x9f   : > { %p3398_p3 = pnand %p3396_p8, %p3382_p1  ;;  %p3404_p11 = scmp.lt.s32.totalorder %s3402_s7, %s3395_s14 }
  0xa1   : > { %p3399_p9 = pneg %p3398_p3  ;;  %p3405_p6 = por %p3404_p11, %p3403_p4 }
  0xa3   : > { %p3406_p13 = pnand %p3405_p6, %p3399_p9 }
  0xa5   : > { %3409 = shalt.err (!%p3406_p13)
}
  0xa6   : > { %3084 = dma.hbm_to_vmem [thread:$0]  (!%p3798_p10), %s3794_s17, 128, %s3802_s16, %s301_s2  }
  0xa7   : > { %s2621_s13 = sshll.u32 %s3534_s28, 8  ;;  %s4210_s15 = sshll.u32 %s3787_s9, 4 }
  0xa8   : > { %s323_s11 = scalar_lea.vmem [#allocation5], %s4210_s15  ;;  %s319_s18 = sand.u32 1, %s3538_s29  }
  0xa9   : > { %s330_s10 = sshll.u32 %s323_s11, 4  ;;  %s3840_s0 = scalar_lea.hbm %s4179_s1, %s2621_s13  ;;  %s3834_s10 = int_to_ptr.vmem [resolvable:$true] %s330_s10 }
  0xaa   : > { %s3842_s3 = scalar_lea.sflag [#allocation6], %s319_s18  ;;  %s3410_s4 = scalar_lea.hbm %s3840_s0, 256 }
  0xab   : > { %p3411_p4 = scmp.ne.s32.totalorder %s3840_s0, %s3410_s4  ;;  %s3415_s17 = scalar_lea.hbm %s4179_s1, 512 }
  0xac   : > { %p3416_p0 = scmp.lt.u32.totalorder %s3840_s0, %s4179_s1  ;;  %p3417_p7 = scmp.lt.u32.totalorder %s3415_s17, %s3410_s4 }
  0xad   : > { %p3413_p9 = pnand %p3411_p4, %p3382_p1  ;;  %p3419_p8 = scmp.lt.u32.totalorder %s3410_s4, %s3840_s0 }
  0xae   : > { %p3418_p5 = por %p3417_p7, %p3416_p0 }
  0xaf   : > { %p3414_p12 = pneg %p3413_p9 }
  0xb0   : > { %p3420_p3 = por %p3419_p8, %p3418_p5 }
  0xb2   : > { %p3421_p11 = pnand %p3420_p3, %p3414_p12 }
  0xb4   : > { %3424 = shalt.err (!%p3421_p11)
}
  0xb5   : > { %s3425_s13 = scalar_lea.vmem %s3834_s10, 256  ;;  %s3547_s11 = smov [#allocation5]  }
  0xb6   : > { %p3426_p6 = scmp.ne.s32.totalorder %s3834_s10, %s3425_s13  ;;  %s3430_s18 = sshll.u32 %s3547_s11, 4  ;;  %s3431_s18 = int_to_ptr.vmem [resolvable:$false] %s3430_s18 }
  0xb7   : > { %s3432_s14 = scalar_lea.vmem %s3431_s18, 512  ;;  %p3433_p9 = scmp.lt.s32.totalorder %s3834_s10, %s3431_s18 }
  0xb8   : > { %p3428_p13 = pnand %p3426_p6, %p3382_p1  ;;  %p3434_p0 = scmp.lt.s32.totalorder %s3432_s14, %s3425_s13 }
  0xba   : > { %p3429_p4 = pneg %p3428_p13  ;;  %p3435_p7 = por %p3434_p0, %p3433_p9 }
  0xbc   : > { %p3436_p5 = pnand %p3435_p7, %p3429_p4 }
  0xbe   : > { %3439 = shalt.err (!%p3436_p5)
}
  0xbf   : > { %s4211_s4 = smov 8   ;;  %s4212_s7 = smov 128  }
  0xc0   : > { %3087 = dma.hbm_to_vmem [thread:$0]  (!%p3798_p10), %s3840_s0, 256, %s3834_s10, %s3842_s3, %s4212_s7, %s4212_s7, %s4211_s4  }
  0xc1   : > { %p4213_p1 = scmp.ne.s32.totalorder %s4197_s8, 0 }
  0xc2   : > { %s3874_s2 = sand.u32 (!%p4213_p1), 1, %s3522_s25  }
  0xc3   : > { %342 = sbr.rel (%p4213_p1) target bundleno = 4108 (0x100c), region = 48  ;;  %s2569_s9 = sshll.u32 (!%p4213_p1), %s3874_s2, 3 }
  0xc4   : > { %s345_s17 = scalar_lea.sflag (!%p4213_p1), [#allocation3], %s3874_s2  ;;  %s3880_s12 = scalar_lea.vmem (!%p4213_p1), [#allocation2], %s2569_s9 }
  0xca   : > { %3493 = dma.done.wait (%p3770_p2), %s345_s17, 128  }
  0xcb   : > { %3495 = vsyncadd (%p3770_p2), %s345_s17, 4294967168  ;;  %s353_s0 = sand.u32 1, %s3626_s30   ;;  %s2570_s3 = sshll.u32 %s3874_s2, 4 }
  0xcc   : > { %s354_s8 = scalar_lea.sflag [#allocation6], %s353_s0  ;;  %s3888_s10 = scalar_lea.vmem [#allocation5], %s2570_s3 }
  0xcd   : > { %3497 = dma.done.wait (%p3770_p2), %s354_s8, 256  }
  0xce   : > { %3499 = vsyncadd (%p3770_p2), %s354_s8, 4294967040  ;;  %p4214_p10 = scmp.eq.s32.totalorder %s3626_s30, 0 }
  0xd0   : > { %3501 = dma.done.wait (%p4214_p10), [#allocation6], 512   ;;  %p4215_p12 = pmov %p4214_p10 }
  0xd1   : > { %p4216_p8 = pmov %p4214_p10 }
  0xd2   : > { %3503 = vsyncadd (%p4215_p12), [#allocation6], 4294966784 }
  0xd3   : > { %3505 = dma.done.wait (%p4216_p8), [#allocation9], 1024   ;;  %p4217_p3 = pmov %p4216_p8 }
  0xd5   : > { %3507 = vsyncadd (%p4217_p3), [#allocation9], 4294966272  ;;  %p4218_p11 = pmov %p4217_p3 }
  0xd6   : > { %p4219_p6 = pmov %p4217_p3 }
  0xd7   : > { %3509 = dma.done.wait (%p4218_p11), [#allocation12], 512  }
  0xd8   : > { %3511 = vsyncadd (%p4219_p6), [#allocation12], 4294966784  ;;  %v3548_v0 = vmov 0.0|0.0   ;;  %vm3549_vm0 = vmmov 0   ;;  %v3550_v1 = vmov 0.0   ;;  %vm428_vm1 = vcmask 261120  }
  0xd9   : > { %2930 = vmatprep.subr.bf16.mxu0 %v3548_v0  ;;  %2730 = vmatprep.mubr.msk.f32.mxu0 %vm3549_vm0, %v3550_v1  ;;  %v416_v2 = vld [vmem:[#allocation8] sm:$0xff]  ;;  %v417_v3 = vld [vmem:[#allocation8 + $0x8] sm:$0xff]  ;;  %v418_v4 = vld [vmem:[#allocation8 + $0x10] sm:$0xff]  ;;  %vm658_vm2 = vcmask 64512   ;;  %vm739_vm4 = vcmask 130048   ;;  %s3551_s30 = smov 120  }
  0xda   : > { %v2936_v5 = vpack.c.bf16 %v417_v3, %v416_v2  ;;  %v419_v6 = vld [vmem:[#allocation8 + $0x18] sm:$0xff]  ;;  %v3910_v7 = vld [vmem:[%s3888_s10] sm:$0xff]  ;;  %v3916_v10 = vld [vmem:[#allocation7 + $0x8] sm:$0xff]  ;;  %v3966_v33 = vpack.i.bf16 %v417_v3, %v416_v2  ;;  %s3552_s19 = smov 112   ;;  %s3553_s16 = smov 104  }
  0xdb   : > { %v2940_v8 = vpack.c.bf16 %v419_v6, %v418_v4  ;;  %2741 = vmatprep.mubr.msk.f32.mxu1 %vm428_vm1, %v3910_v7  ;;  %v3914_v9 = vld [vmem:[#allocation7] sm:$0xff]  ;;  %v414_v11 = vld [vmem:[#allocation7 + $0x10] sm:$0xff]  ;;  %v415_v13 = vld [vmem:[#allocation7 + $0x18] sm:$0xff]  ;;  %v3970_v34 = vpack.i.bf16 %v419_v6, %v418_v4  ;;  %s2618_s11 = sshll.u32 %s3530_s27, 7  ;;  %s408_s18 = scalar_lea.vmem [#allocation13], %s2569_s9 }
  0xdc   : > { %2937 = vmatprep.subr.bf16.mxu1 %v2936_v5  ;;  %v2931_v12 = vpack.c.bf16 %v3916_v10, %v3914_v9  ;;  %v2934_v14 = vpack.c.bf16 %v415_v13, %v414_v11  ;;  %v3922_v15 = vld [vmem:[%s3888_s10 + $0x8] sm:$0xff]  ;;  %vm3938_vm3 = vmpackc.low %vm658_vm2, %vm658_vm2  ;;  %v3948_v23 = vld [vmem:[#allocation10] sm:$0xff]  ;;  %3163 = vrot.lane.b32.xlu1 %v3966_v33, %s3551_s30  ;;  %v3974_v35 = vpack.i.bf16 %v415_v13, %v414_v11  ;;  %s2414_s14 = sshll.u32 %s408_s18, 4  ;;  %s4222_s17 = sld [smem:[#allocation24_spill]]  ;;  %s4130_s14 = int_to_ptr.vmem [resolvable:$true] %s2414_s14 }
  0xdd   : > { %2939 = vmatpush3.bf16.msra.mxu1 %v2936_v5  ;;  %v3925_v16 = vld [vmem:[%s3880_s12] sm:$0xff]  ;;  %v3950_v24 = vld [vmem:[#allocation10 + $0x8] sm:$0xff]  ;;  %v3981_v41 = vpack.i.bf16 %v3916_v10, %v3914_v9  ;;  %s2400_s0 = scalar_lea.sflag [#allocation4], %s3874_s2  ;;  %s3440_s27 = scalar_lea.vmem %s4130_s14, 128 }
  0xde   : > { %2941 = vmatprep.subr.bf16.mxu1 %v2940_v8  ;;  %2932 = vmatpush3.bf16.msra.mxu0 %v2931_v12  ;;  %v3952_v25 = vld [vmem:[#allocation10 + $0x10] sm:$0xff]  ;;  %v2944_v26 = vpack.c.bf16 %v3950_v24, %v3948_v23  ;;  %v3956_v27 = vld [vmem:[#allocation10 + $0x18] sm:$0xff]  ;;  %v4000_v2 = vpack.i.bf16 %v3950_v24, %v3948_v23  ;;  %p3441_p2 = scmp.ne.s32.totalorder %s4130_s14, %s3440_s27  ;;  %p4223_p13 = scmp.ne.s32.totalorder %s4206_s20, 0 }
  0xdf   : > { %2933 = vmatprep.subr.bf16.mxu0 %v3548_v0  ;;  %v2948_v28 = vpack.c.bf16 %v3956_v27, %v3952_v25  ;;  %v4006_v3 = vpack.i.bf16 %v3956_v27, %v3952_v25  ;;  %s3554_s9 = smov [#allocation13]  }
  0xe0   : > { %3168 = vrot.lane.b32.xlu1 %v3970_v34, %s3551_s30  ;;  %p3442_p4 = pnand %p3441_p2, %p4223_p13  ;;  %s3444_s3 = sshll.u32 %s3554_s9, 4  ;;  %s3445_s3 = int_to_ptr.vmem [resolvable:$false] %s3444_s3 }
  0xe1   : > { %2943 = vmatpush3.bf16.msra.mxu1 %v2940_v8  ;;  %s3446_s8 = scalar_lea.vmem %s3445_s3, 256  ;;  %p3447_p0 = scmp.lt.s32.totalorder %s4130_s14, %s3445_s3 }
  0xe2   : > { %2935 = vmatpush3.bf16.msra.mxu0 %v2934_v14  ;;  %2952 = vmatprep.subr.bf16.mxu1 %v3548_v0  ;;  %s4128_s12 = scalar_lea.hbm %s4222_s17, %s2618_s11  ;;  %p3443_p9 = pneg %p3442_p4 }
  0xe3   : > { %2945 = vmatprep.subr.bf16.mxu0 %v2944_v26  ;;  %p3448_p7 = scmp.lt.s32.totalorder %s3446_s8, %s3440_s27 }
  0xe4   : > { %2742 = vmatmul.mubr.msk.f32.vlgmr.msra.gmra.mrb[0].mxu1 %vm428_vm1, %v3922_v15  ;;  %3178 = vrot.lane.b32.xlu1 %v3974_v35, %s3551_s30 }
  0xe5   : > { %2731 = vmatmul.mubr.msk.f32.vlgmr.msra.gmra.mrb[0].mxu0 %vm428_vm1, %v3925_v16  ;;  %2759 = vmatprep.mubr.msk.f32.mxu1 %vm3549_vm0, %v3550_v1  ;;  %p3449_p5 = por %p3448_p7, %p3447_p0 }
  0xe6   : > { %2752 = vmatprep.mubr.msk.f32.mxu0 %vm428_vm1, %v3910_v7  ;;  %2947 = vmatpush3.bf16.msra.mxu0 %v2944_v26 }
  0xe7   : > { %2949 = vmatprep.subr.bf16.mxu0 %v2948_v28  ;;  %p3450_p1 = pnand %p3449_p5, %p3443_p9 }
  0xe8   : > { %3183 = vrot.lane.b32.xlu1 %v4000_v2, %s3551_s30 }
  0xea   : > { %2951 = vmatpush3.bf16.msra.mxu0 %v2948_v28 }
  0xeb   : > { %2956 = vmatprep.subr.bf16.mxu0 %v3548_v0 }
  0xec   : > { %3188 = vrot.lane.b32.xlu1 %v4006_v3, %s3551_s30 }
  0xed   : > { %2753 = vmatmul.mubr.msk.f32.vlgmr.msra.gmra.mrb[2].mxu0 %vm428_vm1, %v3922_v15 }
  0xee   : > { %2766 = vmatprep.mubr.msk.f32.mxu0 %vm3549_vm0, %v3550_v1 }
 0x14e   : > { %v3164_v45 = vpop.permute.xlu1 %3163 }
 0x14f   : > { %v3166_v46 = vunpack.i.h.bf16 %v3164_v45  ;;  %v3165_v47 = vunpack.i.l.bf16 %v3164_v45 }
 0x151   : > { %v2965_v48 = vpack.c.bf16 %v3166_v46, %v3165_v47  ;;  %v424_v47 = vld [vmem:[#allocation11] sm:$0xff] }
 0x152   : > { %v3169_v49 = vpop.permute.xlu1 %3168 }
 0x153   : > { %v3171_v58 = vunpack.i.h.bf16 %v3169_v49  ;;  %v3170_v59 = vunpack.i.l.bf16 %v3169_v49 }
 0x155   : > { %v2969_v63 = vpack.c.bf16 %v3171_v58, %v3170_v59 }
 0x156   : > { %v3179_v51 = vpop.permute.xlu1 %3178 }
 0x157   : > { %v3181_v55 = vunpack.i.h.bf16 %v3179_v51  ;;  %v3180_v56 = vunpack.i.l.bf16 %v3179_v51 }
 0x159   : > { %v2963_v60 = vpack.c.bf16 %v3181_v55, %v3180_v56 }
 0x15a   : > { %v3184_v12 = vpop.permute.xlu1 %3183 }
 0x15b   : > { %v3186_v13 = vunpack.i.h.bf16 %v3184_v12  ;;  %v3185_v14 = vunpack.i.l.bf16 %v3184_v12 }
 0x1b7   : > { %v2743_v17 = vpop.f32.mrb[0].mxu1 }
 0x1b8   : > { %v574_v18 = vpop.f32.mrb[1].mxu1  ;;  %v498_v20 = vpop.f32.mrb[0].mxu0 }
 0x1b9   : > { %v2953_v21 = vpack.c.bf16 %v2743_v17, %v574_v18  ;;  %v2732_v22 = vpop.f32.mrb[1].mxu0  ;;  %v2973_v17 = vpack.c.bf16 %v3186_v13, %v3185_v14  ;;  %v3189_v18 = vpop.permute.xlu1 %3188 }
 0x1bb   : > { %2955 = vmatpush3.bf16.xpose.msk.msra.mxu1 %vm3938_vm3, %v2953_v21  ;;  %v3190_v21 = vunpack.i.l.bf16 %v3189_v18 }
 0x1bc   : > { %2959 = vmatprep.subr.bf16.mxu1 %v3548_v0 }
 0x1c0   : > { %v2754_v42 = vpop.f32.mrb[2].mxu0 }
 0x1c1   : > { %v649_v43 = vpop.f32.mrb[3].mxu0 }
 0x1c2   : > { %2760 = vmatmul.mubr.msk.f32.vlgmr.msra.gmra.mrb[2].mxu1 %vm658_vm2, %v498_v20  ;;  %v2957_v44 = vpack.c.bf16 %v2754_v42, %v649_v43  ;;  %v3191_v20 = vunpack.i.h.bf16 %v3189_v18 }
 0x1c3   : > { %2777 = vmatprep.mubr.msk.f32.mxu1 %vm3549_vm0, %v3550_v1 }
 0x1c4   : > { %2958 = vmatpush3.bf16.msra.mxu0 %v2957_v44  ;;  %v2977_v22 = vpack.c.bf16 %v3191_v20, %v3190_v21 }
 0x1c5   : > { %2966 = vmatprep.subr.bf16.mxu0 %v2965_v48 }
 0x295   : > { %v734_v29 = vpop.f32.mrb[2].mxu1 }
 0x296   : > { %v738_v30 = vmul.f32 0.35355338, %v734_v29  ;;  %v2761_v31 = vpop.f32.mrb[3].mxu1 }
 0x298   : > { %v740_v32 = vsel %vm739_vm4, %v738_v30, -inf }
 0x299   : > { %741 = vmax.xlane.f32.xlu0 %v740_v32 }
 0x326   : > { %v742_v36 = vpop.xlane.xlu0 %741 }
 0x327   : > { %v743_v37 = vsub.f32 %v738_v30, %v742_v36 }
 0x329   : > { %v744_v38 = vmul.f32 1.442695, %v743_v37 }
 0x32b   : > { %3252 = vpow2.f32 %v744_v38  ;;  %v425_v38 = vld [vmem:[#allocation11 + $0x8] sm:$0xff] }
 0x335   : > { %v3253_v39 = vpop.eup %3252 }
 0x336   : > { %v746_v40 = vsel %vm739_vm4, %v3253_v39, 0.0 }
 0x337   : > { %747 = vadd.xlane.f32.xlu0 %v746_v40 }
 0x34d   : > { %3173 = vrot.lane.b32.xlu0 %v3981_v41, %s3551_s30 }
 0x3c4   : > { %v748_v50 = vpop.xlane.xlu0 %747 }
 0x3c5   : > { %3254 = vrcp.f32 %v748_v50 }
 0x3c8   : > { %v3174_v52 = vpop.permute.xlu0 %3173 }
 0x3c9   : > { %v3176_v53 = vunpack.i.h.bf16 %v3174_v52  ;;  %v3175_v54 = vunpack.i.l.bf16 %v3174_v52 }
 0x3cb   : > { %v2960_v57 = vpack.c.bf16 %v3176_v53, %v3175_v54 }
 0x3cd   : > { %2961 = vmatpush3.bf16.msra.mxu1 %v2960_v57 }
 0x3ce   : > { %2962 = vmatprep.subr.bf16.mxu1 %v3548_v0 }
 0x3cf   : > { %v3255_v61 = vpop.eup %3254 }
 0x3d0   : > { %v750_v62 = vmul.f32 %v3255_v61, %v3253_v39 }
 0x3d1   : > { %2964 = vmatpush3.bf16.msra.mxu1 %v2963_v60 }
 0x3d2   : > { %2767 = vmatmul.mubr.msk.f32.vlgmr.msra.gmra.mrb[4].mxu0 %vm739_vm4, %v750_v62  ;;  %2974 = vmatprep.subr.bf16.mxu1 %v2973_v17 }
 0x3d3   : > { %2968 = vmatpush3.bf16.msra.mxu0 %v2965_v48  ;;  %2788 = vmatprep.mubr.msk.f32.mxu0 %vm428_vm1, %v3910_v7 }
 0x3d4   : > { %2970 = vmatprep.subr.bf16.mxu0 %v2969_v63  ;;  %2778 = vmatmul.mubr.msk.f32.vlgmr.msra.gmra.mrb[4].mxu1 %vm428_vm1, %v3925_v16 }
 0x3d5   : > { %2799 = vmatprep.mubr.msk.f32.mxu1 %vm428_vm1, %v3910_v7  ;;  %2976 = vmatpush3.bf16.msra.mxu1 %v2973_v17 }
 0x3d6   : > { %2978 = vmatprep.subr.bf16.mxu1 %v2977_v22 }
 0x3d7   : > { %2972 = vmatpush3.bf16.msra.mxu0 %v2969_v63 }
 0x3d8   : > { %2981 = vmatprep.subr.bf16.mxu0 %v3548_v0 }
 0x3d9   : > { %2980 = vmatpush3.bf16.msra.mxu1 %v2977_v22 }
 0x3da   : > { %2789 = vmatmul.mubr.msk.f32.vlgmr.msra.gmra.mrb[6].mxu0 %vm428_vm1, %v3922_v15  ;;  %2985 = vmatprep.subr.bf16.mxu1 %v3548_v0 }
 0x3db   : > { %2806 = vmatprep.mubr.msk.f32.mxu0 %vm3549_vm0, %v3550_v1 }
 0x3dc   : > { %2800 = vmatmul.mubr.msk.f32.vlgmr.msra.gmra.mrb[6].mxu1 %vm428_vm1, %v3922_v15 }
 0x3dd   : > { %2813 = vmatprep.mubr.msk.f32.mxu1 %vm3549_vm0, %v3550_v1 }
 0x4a5   : > { %v4010_v4 = vpop.f32.mrb[4].mxu0 }
 0x4a6   : > { %v2768_v5 = vpop.f32.mrb[5].mxu0 }
 0x4a7   : > { %v906_v6 = vpop.f32.mrb[4].mxu1 }
 0x4a8   : > { %v2779_v8 = vpop.f32.mrb[5].mxu1 }
 0x4ad   : > { %v2790_v9 = vpop.f32.mrb[6].mxu0 }
 0x4ae   : > { %v992_v10 = vpop.f32.mrb[7].mxu0 }
 0x4af   : > { %v2982_v11 = vpack.c.bf16 %v2790_v9, %v992_v10  ;;  %v2801_v32 = vpop.f32.mrb[6].mxu1 }
 0x4b0   : > { %v1083_v36 = vpop.f32.mrb[7].mxu1 }
 0x4b1   : > { %2984 = vmatpush3.bf16.xpose.msk.msra.mxu0 %vm3938_vm3, %v2982_v11  ;;  %v2986_v37 = vpack.c.bf16 %v2801_v32, %v1083_v36 }
 0x4b2   : > { %2816 = vmatprep.subr.mxu0 %v3550_v1 }
 0x4b3   : > { %2987 = vmatpush3.bf16.msra.mxu1 %v2986_v37 }
 0x4b4   : > { %2821 = vmatprep.subr.mxu1 %v3550_v1 }
 0x4b8   : > { %2807 = vmatmul.mubr.msk.f32.vlgmr.msra.gmra.mrb[8].mxu0 %vm658_vm2, %v906_v6 }
 0x4b9   : > { %2818 = vmatprep.mubr.msk.f32.mxu0 %vm3549_vm0, %v3550_v1  ;;  %2817 = vmatpush3.msra.mxu0 %v425_v38 }
 0x4ba   : > { %2988 = vmatprep.subr.bf16.mxu0 %v3548_v0 }
 0x58b   : > { %v1167_v23 = vpop.f32.mrb[8].mxu0 }
 0x58c   : > { %v1171_v24 = vmul.f32 0.35355338, %v1167_v23  ;;  %v2808_v25 = vpop.f32.mrb[9].mxu0 }
 0x58e   : > { %v1172_v26 = vsel %vm739_vm4, %v1171_v24, -inf }
 0x58f   : > { %1173 = vmax.xlane.f32.xlu1 %v1172_v26 }
 0x5a0   : > { %3193 = vrot.lane.b32.xlu1 %v3966_v33, %s3552_s19 }
 0x5a4   : > { %3203 = vrot.lane.b32.xlu1 %v3981_v41, %s3552_s19 }
 0x5a8   : > { %3208 = vrot.lane.b32.xlu1 %v3974_v35, %s3552_s19 }
 0x5ac   : > { %3213 = vrot.lane.b32.xlu1 %v4000_v2, %s3552_s19 }
 0x61c   : > { %v1174_v27 = vpop.xlane.xlu1 %1173 }
 0x61d   : > { %v1175_v28 = vsub.f32 %v1171_v24, %v1174_v27 }
 0x61f   : > { %v1176_v29 = vmul.f32 1.442695, %v1175_v28 }
 0x620   : > { %v3194_v40 = vpop.permute.xlu1 %3193 }
 0x621   : > { %3256 = vpow2.f32 %v1176_v29  ;;  %v3196_v42 = vunpack.i.h.bf16 %v3194_v40  ;;  %v3195_v43 = vunpack.i.l.bf16 %v3194_v40 }
 0x623   : > { %v2994_v48 = vpack.c.bf16 %v3196_v42, %v3195_v43 }
 0x624   : > { %v3204_v52 = vpop.permute.xlu1 %3203 }
 0x625   : > { %v3206_v53 = vunpack.i.h.bf16 %v3204_v52  ;;  %v3205_v54 = vunpack.i.l.bf16 %v3204_v52 }
 0x627   : > { %v2989_v56 = vpack.c.bf16 %v3206_v53, %v3205_v54 }
 0x628   : > { %v3209_v55 = vpop.permute.xlu1 %3208 }
 0x629   : > { %v3211_v57 = vunpack.i.h.bf16 %v3209_v55  ;;  %v3210_v58 = vunpack.i.l.bf16 %v3209_v55 }
 0x62b   : > { %v3257_v30 = vpop.eup %3256  ;;  %v2992_v61 = vpack.c.bf16 %v3211_v57, %v3210_v58 }
 0x62c   : > { %v1178_v31 = vsel %vm739_vm4, %v3257_v30, 0.0  ;;  %v3214_v13 = vpop.permute.xlu1 %3213 }
 0x62d   : > { %1179 = vadd.xlane.f32.xlu0 %v1178_v31  ;;  %v3216_v17 = vunpack.i.h.bf16 %v3214_v13  ;;  %v3215_v18 = vunpack.i.l.bf16 %v3214_v13 }
 0x62f   : > { %v3002_v22 = vpack.c.bf16 %v3216_v17, %v3215_v18 }
 0x643   : > { %3198 = vrot.lane.b32.xlu0 %v3970_v34, %s3552_s19 }
 0x647   : > { %3218 = vrot.lane.b32.xlu0 %v4006_v3, %s3552_s19 }
 0x6ba   : > { %v1180_v39 = vpop.xlane.xlu0 %1179 }
 0x6bb   : > { %3258 = vrcp.f32 %v1180_v39  ;;  %v426_v39 = vld [vmem:[#allocation11 + $0x10] sm:$0xff] }
 0x6be   : > { %v3199_v44 = vpop.permute.xlu0 %3198 }
 0x6bf   : > { %v3201_v49 = vunpack.i.h.bf16 %v3199_v44  ;;  %v3200_v50 = vunpack.i.l.bf16 %v3199_v44 }
 0x6c1   : > { %v2998_v51 = vpack.c.bf16 %v3201_v49, %v3200_v50 }
 0x6c2   : > { %v3219_v14 = vpop.permute.xlu0 %3218 }
 0x6c3   : > { %v3221_v20 = vunpack.i.h.bf16 %v3219_v14  ;;  %v3220_v21 = vunpack.i.l.bf16 %v3219_v14 }
 0x6c5   : > { %v3259_v45 = vpop.eup %3258  ;;  %v3006_v23 = vpack.c.bf16 %v3221_v20, %v3220_v21 }
 0x6c6   : > { %v1182_v46 = vmul.f32 %v3259_v45, %v3257_v30 }
 0x6c8   : > { %2814 = vmatmul.mubr.msk.f32.vlgmr.msra.gmra.mrb[8].mxu1 %vm739_vm4, %v1182_v46 }
 0x6c9   : > { %2822 = vmatpush3.msra.mxu1 %v424_v47  ;;  %2823 = vmatprep.mubr.msk.f32.mxu1 %vm3549_vm0, %v3550_v1 }
 0x6ca   : > { %2995 = vmatprep.subr.bf16.mxu1 %v2994_v48 }
 0x6cc   : > { %2824 = vmatmul.mubr.msk.f32.vlgmr.msra.gmra.mrb[10].mxu1 %vm658_vm2, %v4010_v4 }
 0x6cd   : > { %2997 = vmatpush3.bf16.msra.mxu1 %v2994_v48  ;;  %2845 = vmatprep.mubr.msk.f32.mxu1 %vm428_vm1, %v3910_v7 }
 0x6ce   : > { %2999 = vmatprep.subr.bf16.mxu1 %v2998_v51 }
 0x6d1   : > { %3001 = vmatpush3.bf16.msra.mxu1 %v2998_v51 }
 0x6d2   : > { %3010 = vmatprep.subr.bf16.mxu1 %v3548_v0 }
 0x6d4   : > { %2846 = vmatmul.mubr.msk.f32.vlgmr.msra.gmra.mrb[12].mxu1 %vm428_vm1, %v3922_v15 }
 0x6d5   : > { %2863 = vmatprep.mubr.msk.f32.mxu1 %vm3549_vm0, %v3550_v1 }
 0x79b   : > { %v1252_v59 = vpop.f32.mrb[8].mxu1 }
 0x79c   : > { %v2815_v60 = vpop.f32.mrb[9].mxu1  ;;  %2819 = vmatmul.mubr.msk.f32.vlgmr.msra.gmra.mrb[10].mxu0 %vm658_vm2, %v1252_v59 }
 0x79d   : > { %2990 = vmatpush3.bf16.msra.mxu0 %v2989_v56  ;;  %2834 = vmatprep.mubr.msk.f32.mxu0 %vm3549_vm0, %v3550_v1 }
 0x79e   : > { %2991 = vmatprep.subr.bf16.mxu0 %v3548_v0 }
 0x79f   : > { %v1398_v62 = vpop.f32.mrb[10].mxu1 }
 0x7a0   : > { %v2825_v63 = vpop.f32.mrb[11].mxu1 }
 0x7a1   : > { %2993 = vmatpush3.bf16.msra.mxu0 %v2992_v61 }
 0x7a2   : > { %3003 = vmatprep.subr.bf16.mxu0 %v3002_v22 }
 0x7a4   : > { %2835 = vmatmul.mubr.msk.f32.vlgmr.msra.gmra.mrb[12].mxu0 %vm428_vm1, %v3925_v16 }
 0x7a5   : > { %2856 = vmatprep.mubr.msk.f32.mxu0 %vm428_vm1, %v3910_v7  ;;  %3005 = vmatpush3.bf16.msra.mxu0 %v3002_v22 }
 0x7a6   : > { %3007 = vmatprep.subr.bf16.mxu0 %v3006_v23 }
 0x7a7   : > { %v2847_v4 = vpop.f32.mrb[12].mxu1 }
 0x7a8   : > { %v1562_v5 = vpop.f32.mrb[13].mxu1 }
 0x7a9   : > { %v3011_v6 = vpack.c.bf16 %v2847_v4, %v1562_v5  ;;  %3009 = vmatpush3.bf16.msra.mxu0 %v3006_v23 }
 0x7aa   : > { %3014 = vmatprep.subr.bf16.mxu0 %v3548_v0 }
 0x7ab   : > { %3013 = vmatpush3.bf16.xpose.msk.msra.mxu1 %vm3938_vm3, %v3011_v6 }
 0x7ac   : > { %2873 = vmatprep.subr.mxu1 %v3550_v1  ;;  %2857 = vmatmul.mubr.msk.f32.vlgmr.msra.gmra.mrb[14].mxu0 %vm428_vm1, %v3922_v15 }
 0x7ad   : > { %2870 = vmatprep.mubr.msk.f32.mxu0 %vm3549_vm0, %v3550_v1 }
 0x86f   : > { %v1325_v8 = vpop.f32.mrb[10].mxu0 }
 0x870   : > { %v4062_v9 = vadd.f32 %v1398_v62, %v1325_v8  ;;  %v2820_v10 = vpop.f32.mrb[11].mxu0 }
 0x877   : > { %v1480_v11 = vpop.f32.mrb[12].mxu0 }
 0x878   : > { %v2836_v12 = vpop.f32.mrb[13].mxu0  ;;  %2864 = vmatmul.mubr.msk.f32.vlgmr.msra.gmra.mrb[14].mxu1 %vm658_vm2, %v1480_v11 }
 0x879   : > { %2875 = vmatprep.mubr.msk.f32.mxu1 %vm3549_vm0, %v3550_v1  ;;  %2874 = vmatpush3.msra.mxu1 %v426_v39 }
 0x87f   : > { %v2858_v36 = vpop.f32.mrb[14].mxu0 }
 0x880   : > { %v1649_v37 = vpop.f32.mrb[15].mxu0 }
 0x881   : > { %v3015_v38 = vpack.c.bf16 %v2858_v36, %v1649_v37 }
 0x883   : > { %3016 = vmatpush3.bf16.msra.mxu0 %v3015_v38 }
 0x884   : > { %3017 = vmatprep.subr.bf16.mxu0 %v3548_v0 }
 0x94b   : > { %v1733_v24 = vpop.f32.mrb[14].mxu1 }
 0x94c   : > { %v1737_v25 = vmul.f32 0.35355338, %v1733_v24  ;;  %v2865_v26 = vpop.f32.mrb[15].mxu1 }
 0x94e   : > { %v1738_v27 = vsel %vm739_vm4, %v1737_v25, -inf }
 0x94f   : > { %1739 = vmax.xlane.f32.xlu1 %v1738_v27 }
 0x960   : > { %3228 = vrot.lane.b32.xlu1 %v3970_v34, %s3553_s16 }
 0x964   : > { %3233 = vrot.lane.b32.xlu1 %v3981_v41, %s3553_s16 }
 0x968   : > { %3243 = vrot.lane.b32.xlu1 %v4000_v2, %s3553_s16 }
 0x9dc   : > { %v1740_v28 = vpop.xlane.xlu1 %1739 }
 0x9dd   : > { %v1741_v29 = vsub.f32 %v1737_v25, %v1740_v28 }
 0x9df   : > { %v1742_v30 = vmul.f32 1.442695, %v1741_v29  ;;  %v2616_v29 = vld [vmem:[%s4184_s6] ss:$0 sm:$0xff] }
 0x9e1   : > { %3260 = vpow2.f32 %v1742_v30 }
 0x9eb   : > { %v3261_v31 = vpop.eup %3260 }
 0x9ec   : > { %v1744_v32 = vsel %vm739_vm4, %v3261_v31, 0.0 }
 0x9ed   : > { %1745 = vadd.xlane.f32.xlu0 %v1744_v32 }
 0xa03   : > { %3223 = vrot.lane.b32.xlu0 %v3966_v33, %s3553_s16  ;;  %v3229_v33 = vpop.permute.xlu1 %3228 }
 0xa04   : > { %v3231_v53 = vunpack.i.h.bf16 %v3229_v33  ;;  %v3230_v54 = vunpack.i.l.bf16 %v3229_v33 }
 0xa06   : > { %v3027_v55 = vpack.c.bf16 %v3231_v53, %v3230_v54 }
 0xa07   : > { %3238 = vrot.lane.b32.xlu0 %v3974_v35, %s3553_s16  ;;  %v3234_v34 = vpop.permute.xlu1 %3233 }
 0xa08   : > { %v3236_v41 = vunpack.i.h.bf16 %v3234_v34  ;;  %v3235_v48 = vunpack.i.l.bf16 %v3234_v34 }
 0xa0a   : > { %v3018_v49 = vpack.c.bf16 %v3236_v41, %v3235_v48 }
 0xa0b   : > { %3248 = vrot.lane.b32.xlu0 %v4006_v3, %s3553_s16  ;;  %v3244_v2 = vpop.permute.xlu1 %3243 }
 0xa0c   : > { %v3246_v3 = vunpack.i.h.bf16 %v3244_v2  ;;  %v3245_v5 = vunpack.i.l.bf16 %v3244_v2 }
 0xa7a   : > { %v1746_v40 = vpop.xlane.xlu0 %1745 }
 0xa7b   : > { %3262 = vrcp.f32 %v1746_v40 }
 0xa7e   : > { %v3224_v42 = vpop.permute.xlu0 %3223 }
 0xa7f   : > { %v3226_v43 = vunpack.i.h.bf16 %v3224_v42  ;;  %v3225_v44 = vunpack.i.l.bf16 %v3224_v42 }
 0xa81   : > { %v3023_v45 = vpack.c.bf16 %v3226_v43, %v3225_v44 }
 0xa82   : > { %v3239_v35 = vpop.permute.xlu0 %3238 }
 0xa83   : > { %3024 = vmatprep.subr.bf16.mxu1 %v3023_v45  ;;  %v3241_v50 = vunpack.i.h.bf16 %v3239_v35  ;;  %v3240_v51 = vunpack.i.l.bf16 %v3239_v35 }
 0xa85   : > { %v3263_v46 = vpop.eup %3262  ;;  %v3021_v52 = vpack.c.bf16 %v3241_v50, %v3240_v51 }
 0xa86   : > { %v1748_v47 = vmul.f32 %v3263_v46, %v3261_v31  ;;  %v3249_v4 = vpop.permute.xlu0 %3248 }
 0xa87   : > { %v3251_v6 = vunpack.i.h.bf16 %v3249_v4  ;;  %v3250_v8 = vunpack.i.l.bf16 %v3249_v4 }
 0xa88   : > { %2871 = vmatmul.mubr.msk.f32.vlgmr.msra.gmra.mrb[16].mxu0 %vm739_vm4, %v1748_v47 }
 0xa89   : > { %2886 = vmatprep.mubr.msk.f32.mxu0 %vm3549_vm0, %v3550_v1  ;;  %3019 = vmatpush3.bf16.msra.mxu0 %v3018_v49  ;;  %v3035_v10 = vpack.c.bf16 %v3251_v6, %v3250_v8 }
 0xa8a   : > { %3020 = vmatprep.subr.bf16.mxu0 %v3548_v0 }
 0xa8d   : > { %3022 = vmatpush3.bf16.msra.mxu0 %v3021_v52 }
 0xa90   : > { %2887 = vmatmul.mubr.msk.f32.vlgmr.msra.gmra.mrb[18].mxu0 %vm428_vm1, %v3925_v16 }
 0xa91   : > { %2908 = vmatprep.mubr.msk.f32.mxu0 %vm428_vm1, %v3910_v7 }
 0xb5b   : > { %v1818_v56 = vpop.f32.mrb[16].mxu0 }
 0xb5c   : > { %v2872_v57 = vpop.f32.mrb[17].mxu0  ;;  %2876 = vmatmul.mubr.msk.f32.vlgmr.msra.gmra.mrb[16].mxu1 %vm658_vm2, %v1818_v56 }
 0xb5d   : > { %3026 = vmatpush3.bf16.msra.mxu1 %v3023_v45  ;;  %2897 = vmatprep.mubr.msk.f32.mxu1 %vm428_vm1, %v3910_v7 }
 0xb5e   : > { %3028 = vmatprep.subr.bf16.mxu1 %v3027_v55 }
 0xb61   : > { %3030 = vmatpush3.bf16.msra.mxu1 %v3027_v55 }
 0xb62   : > { %3039 = vmatprep.subr.bf16.mxu1 %v3548_v0 }
 0xb63   : > { %v1974_v16 = vpop.f32.mrb[18].mxu0 }
 0xb64   : > { %2898 = vmatmul.mubr.msk.f32.vlgmr.msra.gmra.mrb[18].mxu1 %vm428_vm1, %v3922_v15  ;;  %v2888_v58 = vpop.f32.mrb[19].mxu0 }
 0xb65   : > { %2915 = vmatprep.mubr.msk.f32.mxu1 %vm3549_vm0, %v3550_v1 }
 0xc2f   : > { %v1891_v59 = vpop.f32.mrb[16].mxu1 }
 0xc30   : > { %v1895_v7 = vadd.f32 %v1891_v59, %v4062_v9  ;;  %v2877_v60 = vpop.f32.mrb[17].mxu1  ;;  %v3031_v9 = vpack.c.bf16 %v3246_v3, %v3245_v5 }
 0xc32   : > { %3032 = vmatprep.subr.bf16.mxu0 %v3031_v9 }
 0xc33   : > { %3034 = vmatpush3.bf16.msra.mxu0 %v3031_v9 }
 0xc34   : > { %3036 = vmatprep.subr.bf16.mxu0 %v3035_v10 }
 0xc37   : > { %v2899_v61 = vpop.f32.mrb[18].mxu1  ;;  %3038 = vmatpush3.bf16.msra.mxu0 %v3035_v10 }
 0xc38   : > { %v2056_v62 = vpop.f32.mrb[19].mxu1  ;;  %3043 = vmatprep.subr.bf16.mxu0 %v3548_v0 }
 0xc39   : > { %v3040_v63 = vpack.c.bf16 %v2899_v61, %v2056_v62 }
 0xc3a   : > { %2909 = vmatmul.mubr.msk.f32.vlgmr.msra.gmra.mrb[20].mxu0 %vm428_vm1, %v3922_v15 }
 0xc3b   : > { %3042 = vmatpush3.bf16.xpose.msk.msra.mxu1 %vm3938_vm3, %v3040_v63  ;;  %2922 = vmatprep.mubr.msk.f32.mxu0 %vm3549_vm0, %v3550_v1 }
 0xc3c   : > { %2925 = vmatprep.subr.mxu1 %v3550_v1 }
 0xc42   : > { %2916 = vmatmul.mubr.msk.f32.vlgmr.msra.gmra.mrb[20].mxu1 %vm658_vm2, %v1974_v16 }
 0xc43   : > { %2927 = vmatprep.mubr.msk.f32.mxu1 %vm3549_vm0, %v3550_v1  ;;  %v427_v1 = vld [vmem:[#allocation11 + $0x18] sm:$0xff] }
 0xc44   : > { %2926 = vmatpush3.msra.mxu1 %v427_v1 }
 0xd0d   : > { %v2910_v0 = vpop.f32.mrb[20].mxu0 }
 0xd0e   : > { %v2143_v15 = vpop.f32.mrb[21].mxu0 }
 0xd0f   : > { %v3044_v22 = vpack.c.bf16 %v2910_v0, %v2143_v15 }
 0xd11   : > { %3045 = vmatpush3.bf16.msra.mxu0 %v3044_v22 }
 0xd15   : > { %v2227_v19 = vpop.f32.mrb[20].mxu1 }
 0xd16   : > { %v2231_v11 = vmul.f32 0.35355338, %v2227_v19  ;;  %v2917_v12 = vpop.f32.mrb[21].mxu1 }
 0xd18   : > { %v2232_v13 = vsel %vm739_vm4, %v2231_v11, -inf }
 0xd19   : > { %2233 = vmax.xlane.f32.xlu1 %v2232_v13 }
 0xda6   : > { %v2234_v14 = vpop.xlane.xlu1 %2233 }
 0xda7   : > { %v2235_v17 = vsub.f32 %v2231_v11, %v2234_v14 }
 0xda9   : > { %v2236_v18 = vmul.f32 1.442695, %v2235_v17 }
 0xdab   : > { %3264 = vpow2.f32 %v2236_v18 }
 0xdb5   : > { %v3265_v20 = vpop.eup %3264 }
 0xdb6   : > { %v2238_v21 = vsel %vm739_vm4, %v3265_v20, 0.0 }
 0xdb7   : > { %2239 = vadd.xlane.f32.xlu0 %v2238_v21 }
 0xe44   : > { %v2240_v23 = vpop.xlane.xlu0 %2239 }
 0xe45   : > { %3266 = vrcp.f32 %v2240_v23 }
 0xe4f   : > { %v3267_v24 = vpop.eup %3266 }
 0xe50   : > { %v2242_v25 = vmul.f32 %v3267_v24, %v3265_v20 }
 0xe52   : > { %2923 = vmatmul.mubr.msk.f32.vlgmr.msra.gmra.mrb[22].mxu0 %vm739_vm4, %v2242_v25 }
 0xf25   : > { %v2312_v26 = vpop.f32.mrb[22].mxu0 }
 0xf26   : > { %v2924_v27 = vpop.f32.mrb[23].mxu0  ;;  %2928 = vmatmul.mubr.msk.f32.vlgmr.msra.gmra.mrb[22].mxu1 %vm658_vm2, %v2312_v26 }
 0xff9   : > { %v2385_v28 = vpop.f32.mrb[22].mxu1 }
 0xffa   : > { %v2389_v30 = vadd.f32 %v2385_v28, %v1895_v7  ;;  %v2929_v31 = vpop.f32.mrb[23].mxu1 }
 0xffc   : > { %v2397_v32 = vadd.f32 %v2616_v29, %v2389_v30 }
 0xffe   : > { %2398 = vst.msk [vmem:[%s408_s18] sm:$0xff] %vm428_vm1, %v2397_v32 }
 0xfff   : > { %3453 = shalt.err (!%p3450_p1)
}
0x1000   : > { %s3454_s2 = scalar_lea.hbm %s4128_s12, 128  ;;  %s3458_s19 = scalar_lea.hbm %s4222_s17, 256 }
0x1001   : > { %p3455_p10 = scmp.ne.s32.totalorder %s4128_s12, %s3454_s2  ;;  %p3459_p3 = scmp.lt.u32.totalorder %s4128_s12, %s4222_s17 }
0x1002   : > { %p3460_p11 = scmp.lt.u32.totalorder %s3458_s19, %s3454_s2  ;;  %p3462_p2 = scmp.lt.u32.totalorder %s3454_s2, %s4128_s12 }
0x1003   : > { %p3456_p12 = pnand %p3455_p10, %p4223_p13 }
0x1004   : > { %p3461_p6 = por %p3460_p11, %p3459_p3 }
0x1005   : > { %p3457_p8 = pneg %p3456_p12 }
0x1006   : > { %p3463_p4 = por %p3462_p2, %p3461_p6 }
0x1008   : > { %p3464_p9 = pnand %p3463_p4, %p3457_p8 }
0x100a   : > { %3467 = shalt.err (!%p3464_p9)
}
0x100b   : > { %3066 = dma.vmem_to_hbm [thread:$0]  (%p4223_p13), %s4130_s14, 128, %s4128_s12, %s2400_s0  }
0x100c PF: > { %s2426_s13 = sand.u32 1, %s3518_s24   ;;  %p4224_p0 = scmp.ne.s32.totalorder %s4207_s23, 0 }
0x100d   : > { %p4225_p7 = scmp.ge.s32.totalorder %s3538_s29, 2  ;;  %s2427_s11 = scalar_lea.sflag [#allocation4], %s2426_s13 }
0x100f   : > { %p3089_p5 = pnand %p4225_p7, %p4224_p0 }
0x1011   : > { %3513 = dma.done.wait (!%p3089_p5), %s2427_s11, 128  }
0x1012   : > { %3515 = vsyncadd (!%p3089_p5), %s2427_s11, 4294967168  ;;  %s28_s29 = sadd.s32 1, %s3538_s29   ;;  %s4226_s24 = smov %s3522_s25 }
0x1013   : > { %p25_p1 = scmp.ge.s32.totalorder %s28_s29, 4   ;;  %s4227_s25 = smov %s3526_s26 }
0x1014   : > { %s4228_s26 = smov %s3779_s22  ;;  %s4229_s27 = smov %s3534_s28 }
0x1015   : > { %s4230_s28 = smov %s4232_s21  ;;  %27 = sbr.rel (!%p25_p1) target bundleno = 16 (0x10), region = 122 }
0x101c   :  { %2432 = vsyncpa [#allocation3], 1 }
0x101d   :  { %2434 = vsyncpa [#allocation3 + $0x1], 1 }
0x101e   :  { %2435 = vsyncpa [#allocation6], 1 }
0x101f   :  { %2437 = vsyncpa [#allocation6 + $0x1], 1 }
0x1020   :  { %2438 = vsyncpa [#allocation9], 1 }
0x1021   :  { %2439 = vsyncpa [#allocation12], 1 }
0x1022   :  { %2440 = vsyncpa [#allocation4], 1 }
0x1023   :  { %2442 = vsyncpa [#allocation4 + $0x1], 1 }

</bundles_post_ra>
